<compile_context>
chip_gen: v6e
topology: v6e:2x2x1
jax: 0.10.0
libtpu: 0.0.40
codegen_flags: <defaults>
</compile_context>

<pallas_src>
import functools

import jax
import jax.numpy as jnp
from jax.experimental import pallas as pl
from jax.experimental.pallas import tpu as pltpu


def _attention_fused_kernel(x_ref, w_ref, e_ref, o_ref, *, split, hp, hp_pad,
                            negative_slope):
    S = split
    TM = o_ref.shape[0]
    D = x_ref.shape[-1]
    C = w_ref.shape[0]            # hp_pad + num_heads

    # (S, TM, D) -> (S*TM, D): merging the leading dim into the 8-aligned sublane dim is a
    # layout no-op (TM is a multiple of 8 or the full batch), so the MXU sees M = S*TM.
    x2 = x_ref[...].reshape(S * TM, D)

    # One fused MXU pass: projected features for all heads + attention logits (q folded into
    # the trailing rows of w_ref).  bf16 operands, f32 accumulation.
    y = jax.lax.dot_general(
        x2, w_ref[...],
        dimension_numbers=(((1,), (1,)), ((), ())),
        preferred_element_type=jnp.float32,
    )                                               # (S*TM, C) f32
    y3 = y.reshape(S, TM, C)                        # free slab split

    # Attention logits live in the vreg-aligned lane slice [hp_pad, hp_pad + H).
    scores = y3[:, :, hp_pad:]                      # (S, TM, H) f32
    scores = jnp.where(scores > 0, scores, negative_slope * scores)   # LeakyReLU(0.2), f32 VPU

    # Numerically stable softmax over the split axis == leading slab axis: elementwise VPU
    # max/add across S slabs, EUP exp + approx reciprocal.  All math stays f32.
    m = jnp.max(scores, axis=0, keepdims=True)
    ez = jnp.exp(scores - m)
    att = ez * pl.reciprocal(jnp.sum(ez, axis=0, keepdims=True), approx=True)   # (S, TM, H)

    # Weighted sum over split, accumulated slab-by-slab so the full (S, TM, HP) f32 product is
    # never materialized.  Head -> feature-lane broadcast via the tiny constant matmul E.
    e = e_ref[...]                                  # (H, HP) bf16, exact 0/1
    acc = jnp.zeros((TM, hp), jnp.float32)
    for s in range(S):                              # static & small
        att_full = jax.lax.dot_general(
            att[s].astype(e.dtype), e,
            dimension_numbers=(((1,), (0,)), ((), ())),
            preferred_element_type=jnp.float32,
        )                                           # (TM, HP) f32
        acc = acc + y3[s, :, :hp] * att_full
    o_ref[...] = acc.astype(o_ref.dtype)


def attention_module_forward(x, W, q, *, split, negative_slope=0.2,
                             block_n=None, mxu_dtype=jnp.bfloat16):
    """x: (N, split*input_dim) (anything reshapeable to (N, split, input_dim)).
    W: (num_heads, per_dim, input_dim); q: (num_heads, 1, per_dim).
    Returns (N, num_heads*per_dim), matching torch.cat over heads.
    Note: bf16 MXU operands, folded-q reassociation and the approx reciprocal introduce small
    (~1e-2 relative) numerical differences vs an exact f32 reference."""
    num_heads, per_dim, input_dim = W.shape
    N = x.shape[0]
    HP = num_heads * per_dim
    out_dtype = x.dtype

    # Mirror torch's x.resize(N, split, input_dim); put `split` in front so the kernel's
    # projection matmul gets contiguous (block_n, D) rows per slab.  The transpose fuses with
    # the bf16 cast (one HBM pass either way; activations would normally already be bf16).
    x3 = x.reshape(N, split, input_dim)
    xs = jnp.transpose(x3, (1, 0, 2)).astype(mxu_dtype)            # (split, N, D)

    # Fused projection weights: rows [0, HP) = per-head W, rows [HP, HP_pad) = zero padding,
    # rows [HP_pad, HP_pad+H) = V where V[h] = W_h^T q_h (q folded into the projection).
    hp_pad = HP if HP % 128 == 0 else ((HP + 127) // 128) * 128
    Wf32 = W.astype(jnp.float32)
    V = jnp.einsum('hpd,hp->hd', Wf32, q[:, 0, :].astype(jnp.float32))   # (H, D)
    W_aug = jnp.zeros((hp_pad + num_heads, input_dim), jnp.float32)
    W_aug = W_aug.at[:HP].set(Wf32.reshape(HP, input_dim))
    W_aug = W_aug.at[hp_pad:].set(V)
    W_aug = W_aug.astype(mxu_dtype)

    # Head -> feature-lane expander E[h, h*P + p] = 1 (exact in bf16).
    E = jnp.repeat(jnp.eye(num_heads, dtype=jnp.float32), per_dim, axis=1).astype(mxu_dtype)

    # ---- Per-generation tile sizing (VMEM budget) --------------------------------------
    try:
        vmem_cap = int(getattr(pltpu.get_tpu_info(), "vmem_capacity_bytes", 64 << 20))
    except Exception:
        vmem_cap = 64 << 20                         # conservative: v7x per-core VMEM
    C = hp_pad + num_heads
    ib = jnp.dtype(mxu_dtype).itemsize
    ob = jnp.dtype(out_dtype).itemsize
    per_row = (2 * split * input_dim * ib           # x tile, double buffered
               + 2 * HP * ob                        # output tile, double buffered
               + 4 * (split * C + 2 * HP + 4 * split * num_heads))   # f32 in-kernel temporaries
    weight_bytes = 2 * (C * input_dim + num_heads * HP) * ib        # resident weight buffers

    if block_n is None:
        if N < 16:
            block_n = N                             # tiny batch: single full tile
        else:
            budget = int(0.35 * vmem_cap)           # tile working-set target
            bn = (budget - weight_bytes) // max(per_row, 1)
            bn = int(max(8, min(bn, 1024, N)))
            if bn >= N:                             # guarantee >= 2 grid steps (v7x: 2 TCs)
                bn = max(8, N // 2)
            block_n = max(8, (bn // 8) * 8)
    assert block_n == N or block_n % 8 == 0, "block_n must be a multiple of 8 or equal N"

    est = weight_bytes + per_row * block_n + (2 << 20)
    vmem_limit = int(min(int(0.6 * vmem_cap), max(32 << 20, int(1.5 * est))))
    vmem_limit = max(vmem_limit, est)

    grid = (pl.cdiv(N, block_n),)
    kernel = functools.partial(_attention_fused_kernel, split=split, hp=HP,
                               hp_pad=hp_pad, negative_slope=negative_slope)

    out = pl.pallas_call(
        kernel,
        out_shape=jax.ShapeDtypeStruct((N, HP), out_dtype),
        grid=grid,
        in_specs=[
            pl.BlockSpec((split, block_n, input_dim), lambda i: (0, i, 0)),   # x tile
            pl.BlockSpec((C, input_dim), lambda i: (0, 0)),                   # fused W (resident)
            pl.BlockSpec((num_heads, HP), lambda i: (0, 0)),                  # expander (resident)
        ],
        out_specs=pl.BlockSpec((block_n, HP), lambda i: (i, 0)),              # lane-dense output
        compiler_params=pltpu.CompilerParams(
            dimension_semantics=("parallel",),
            vmem_limit_bytes=vmem_limit,
        ),
    )(xs, W_aug, E)
    return out


def init_params(key, input_dim, num_heads):
    """Deterministic synthetic init matching the module's parameter shapes."""
    per_dim = input_dim // num_heads
    kw, kq = jax.random.split(key)
    # Linear(input_dim, per_dim, bias=False), glorot-uniform weight (per_dim, input_dim).
    limit_w = (6.0 / (input_dim + per_dim)) ** 0.5
    W = jax.random.uniform(kw, (num_heads, per_dim, input_dim), jnp.float32,
                           minval=-limit_w, maxval=limit_w)
    # q: (per_dim, 1) with xavier_uniform(gain=1.414); stored transposed as (1, per_dim).
    gain = 1.414
    limit_q = gain * (6.0 / (per_dim + 1)) ** 0.5
    q = jax.random.uniform(kq, (num_heads, 1, per_dim), jnp.float32,
                           minval=-limit_q, maxval=limit_q)
    return W, q


def reference_forward(x, W, q, *, split):
    """Pure-JAX f32 reference mirroring the PyTorch forward exactly."""
    H, P, D = W.shape
    N = x.shape[0]
    x3 = x.reshape(N, split, D)
    outs = []
    for h in range(H):
        xp = jnp.einsum('nsd,pd->nsp', x3, W[h])
        s = jnp.einsum('nsp,p->ns', xp, q[h, 0])[..., None]
        s = jnp.where(s > 0, s, 0.2 * s)
        att = jax.nn.softmax(s, axis=1)
        outs.append(jnp.sum(xp * att, axis=1))
    return jnp.concatenate(outs, axis=1)


if __name__ == "__main__":
    # Small shapes consistent with the module.
    N = 8
    split = 4
    input_dim = 32
    num_heads = 4

    key = jax.random.PRNGKey(0)
    kx, kp = jax.random.split(key)
    # Input carries N * split * input_dim elements (torch .resize reinterprets the buffer).
    x = jax.random.normal(kx, (N, split * input_dim), dtype=jnp.float32)
    W, q = init_params(kp, input_dim, num_heads)

    out = attention_module_forward(x, W, q, split=split)
    out = jax.block_until_ready(out)

    ref = reference_forward(x, W, q, split=split)
    assert out.shape == (N, input_dim), out.shape   # HP == input_dim in this configuration
    # bf16 MXU operands + folded-q reassociation + approx reciprocal -> relaxed tolerance.
    err = float(jnp.max(jnp.abs(out.astype(jnp.float32) - ref)))
    assert jnp.allclose(out.astype(jnp.float32), ref, atol=7.5e-2, rtol=5e-2), \
        f"mismatch vs JAX reference (max |err| = {err})"

    print("KERNEL_OK")
</pallas_src>

<mosaic_0001>
module attributes {stable_mosaic.version = 11 : i64} {
  func.func @_attention_fused_kernel(%arg0: i32, %arg1: memref<4x8x32xbf16, #tpu.memory_space<vmem>>, %arg2: memref<132x32xbf16, #tpu.memory_space<vmem>>, %arg3: memref<4x32xbf16, #tpu.memory_space<vmem>>, %arg4: memref<8x32xf32, #tpu.memory_space<vmem>>) attributes {dimension_semantics = [#tpu.dimension_semantics<parallel>], iteration_bounds = array<i64: 1>, scalar_prefetch = 0 : i64, scratch_operands = 0 : i64, tpu.core_type = #tpu.core_type<tc>, window_params = [{transform_indices = @transform_0, window_bounds = array<i64: 4, 8, 32>}, {pipeline_mode = #tpu.pipeline_mode<synchronous>, transform_indices = @transform_1, window_bounds = array<i64: 132, 32>}, {pipeline_mode = #tpu.pipeline_mode<synchronous>, transform_indices = @transform_2, window_bounds = array<i64: 4, 32>}, {transform_indices = @transform_3, window_bounds = array<i64: 8, 32>}]} {
    %c0 = arith.constant 0 : index
    %c0_0 = arith.constant 0 : index
    %c0_1 = arith.constant 0 : index
    %0 = vector.load %arg1[%c0, %c0_0, %c0_1] : memref<4x8x32xbf16, #tpu.memory_space<vmem>>, vector<4x8x32xbf16>
    %1 = vector.shape_cast %0 : vector<4x8x32xbf16> to vector<32x32xbf16>
    %c0_2 = arith.constant 0 : index
    %c0_3 = arith.constant 0 : index
    %2 = vector.load %arg2[%c0_2, %c0_3] : memref<132x32xbf16, #tpu.memory_space<vmem>>, vector<132x32xbf16>
    %cst = arith.constant dense<0.000000e+00> : vector<32x132xf32>
    %3 = tpu.matmul %1, %2, %cst {dimension_numbers = #tpu.dot_dimension_numbers<[1], [1], [0], [0], [0, 0, 1, 0], [], []>} : vector<32x32xbf16>, vector<132x32xbf16>, vector<32x132xf32> -> vector<32x132xf32>
    %4 = vector.shape_cast %3 : vector<32x132xf32> to vector<4x8x132xf32>
    %5 = vector.extract_strided_slice %4 {offsets = [0, 0, 128], sizes = [4, 8, 4], strides = [1, 1, 1]} : vector<4x8x132xf32> to vector<4x8x4xf32>
    %cst_4 = arith.constant 0.000000e+00 : f32
    %6 = vector.broadcast %cst_4 : f32 to vector<4x8x4xf32>
    %7 = arith.cmpf ogt, %5, %6 : vector<4x8x4xf32>
    %cst_5 = arith.constant 2.000000e-01 : f32
    %8 = vector.broadcast %cst_5 : f32 to vector<4x8x4xf32>
    %9 = arith.mulf %8, %5 : vector<4x8x4xf32>
    %10 = arith.select %7, %5, %9 : vector<4x8x4xi1>, vector<4x8x4xf32>
    %cst_6 = arith.constant dense<0xFF800000> : vector<8x4xf32>
    %11 = vector.multi_reduction <maximumf>, %10, %cst_6 [0] : vector<4x8x4xf32> to vector<8x4xf32>
    %12 = vector.shape_cast %11 : vector<8x4xf32> to vector<1x8x4xf32>
    %13 = vector.broadcast %12 : vector<1x8x4xf32> to vector<4x8x4xf32>
    %14 = arith.subf %10, %13 : vector<4x8x4xf32>
    %15 = math.exp %14 : vector<4x8x4xf32>
    %cst_7 = arith.constant dense<0.000000e+00> : vector<8x4xf32>
    %16 = vector.multi_reduction <add>, %15, %cst_7 [0] : vector<4x8x4xf32> to vector<8x4xf32>
    %17 = vector.shape_cast %16 : vector<8x4xf32> to vector<1x8x4xf32>
    %18 = tpu.reciprocal %17 {approx = true} : vector<1x8x4xf32> -> vector<1x8x4xf32>
    %19 = vector.broadcast %18 : vector<1x8x4xf32> to vector<4x8x4xf32>
    %20 = arith.mulf %15, %19 : vector<4x8x4xf32>
    %c0_8 = arith.constant 0 : index
    %c0_9 = arith.constant 0 : index
    %21 = vector.load %arg3[%c0_8, %c0_9] : memref<4x32xbf16, #tpu.memory_space<vmem>>, vector<4x32xbf16>
    %cst_10 = arith.constant 0.000000e+00 : f32
    %22 = vector.broadcast %cst_10 : f32 to vector<8x32xf32>
    %23 = vector.extract_strided_slice %20 {offsets = [0, 0, 0], sizes = [1, 8, 4], strides = [1, 1, 1]} : vector<4x8x4xf32> to vector<1x8x4xf32>
    %24 = vector.shape_cast %23 : vector<1x8x4xf32> to vector<8x4xf32>
    %25 = arith.truncf %24 : vector<8x4xf32> to vector<8x4xbf16>
    %cst_11 = arith.constant dense<0.000000e+00> : vector<8x32xf32>
    %26 = tpu.matmul %25, %21, %cst_11 {dimension_numbers = #tpu.dot_dimension_numbers<[1], [0], [0], [1], [0, 0, 1, 1], [], []>} : vector<8x4xbf16>, vector<4x32xbf16>, vector<8x32xf32> -> vector<8x32xf32>
    %27 = vector.extract_strided_slice %4 {offsets = [0, 0, 0], sizes = [1, 8, 32], strides = [1, 1, 1]} : vector<4x8x132xf32> to vector<1x8x32xf32>
    %28 = vector.shape_cast %27 : vector<1x8x32xf32> to vector<8x32xf32>
    %29 = arith.mulf %28, %26 : vector<8x32xf32>
    %30 = arith.addf %22, %29 : vector<8x32xf32>
    %31 = vector.extract_strided_slice %20 {offsets = [1, 0, 0], sizes = [1, 8, 4], strides = [1, 1, 1]} : vector<4x8x4xf32> to vector<1x8x4xf32>
    %32 = vector.shape_cast %31 : vector<1x8x4xf32> to vector<8x4xf32>
    %33 = arith.truncf %32 : vector<8x4xf32> to vector<8x4xbf16>
    %cst_12 = arith.constant dense<0.000000e+00> : vector<8x32xf32>
    %34 = tpu.matmul %33, %21, %cst_12 {dimension_numbers = #tpu.dot_dimension_numbers<[1], [0], [0], [1], [0, 0, 1, 1], [], []>} : vector<8x4xbf16>, vector<4x32xbf16>, vector<8x32xf32> -> vector<8x32xf32>
    %35 = vector.extract_strided_slice %4 {offsets = [1, 0, 0], sizes = [1, 8, 32], strides = [1, 1, 1]} : vector<4x8x132xf32> to vector<1x8x32xf32>
    %36 = vector.shape_cast %35 : vector<1x8x32xf32> to vector<8x32xf32>
    %37 = arith.mulf %36, %34 : vector<8x32xf32>
    %38 = arith.addf %30, %37 : vector<8x32xf32>
    %39 = vector.extract_strided_slice %20 {offsets = [2, 0, 0], sizes = [1, 8, 4], strides = [1, 1, 1]} : vector<4x8x4xf32> to vector<1x8x4xf32>
    %40 = vector.shape_cast %39 : vector<1x8x4xf32> to vector<8x4xf32>
    %41 = arith.truncf %40 : vector<8x4xf32> to vector<8x4xbf16>
    %cst_13 = arith.constant dense<0.000000e+00> : vector<8x32xf32>
    %42 = tpu.matmul %41, %21, %cst_13 {dimension_numbers = #tpu.dot_dimension_numbers<[1], [0], [0], [1], [0, 0, 1, 1], [], []>} : vector<8x4xbf16>, vector<4x32xbf16>, vector<8x32xf32> -> vector<8x32xf32>
    %43 = vector.extract_strided_slice %4 {offsets = [2, 0, 0], sizes = [1, 8, 32], strides = [1, 1, 1]} : vector<4x8x132xf32> to vector<1x8x32xf32>
    %44 = vector.shape_cast %43 : vector<1x8x32xf32> to vector<8x32xf32>
    %45 = arith.mulf %44, %42 : vector<8x32xf32>
    %46 = arith.addf %38, %45 : vector<8x32xf32>
    %47 = vector.extract_strided_slice %20 {offsets = [3, 0, 0], sizes = [1, 8, 4], strides = [1, 1, 1]} : vector<4x8x4xf32> to vector<1x8x4xf32>
    %48 = vector.shape_cast %47 : vector<1x8x4xf32> to vector<8x4xf32>
    %49 = arith.truncf %48 : vector<8x4xf32> to vector<8x4xbf16>
    %cst_14 = arith.constant dense<0.000000e+00> : vector<8x32xf32>
    %50 = tpu.matmul %49, %21, %cst_14 {dimension_numbers = #tpu.dot_dimension_numbers<[1], [0], [0], [1], [0, 0, 1, 1], [], []>} : vector<8x4xbf16>, vector<4x32xbf16>, vector<8x32xf32> -> vector<8x32xf32>
    %51 = vector.extract_strided_slice %4 {offsets = [3, 0, 0], sizes = [1, 8, 32], strides = [1, 1, 1]} : vector<4x8x132xf32> to vector<1x8x32xf32>
    %52 = vector.shape_cast %51 : vector<1x8x32xf32> to vector<8x32xf32>
    %53 = arith.mulf %52, %50 : vector<8x32xf32>
    %54 = arith.addf %46, %53 : vector<8x32xf32>
    %c0_15 = arith.constant 0 : index
    %c0_16 = arith.constant 0 : index
    %55 = vector.load %arg4[%c0_15, %c0_16] : memref<8x32xf32, #tpu.memory_space<vmem>>, vector<8x32xf32>
    tpu.vector_store %arg4[%c0_15, %c0_16], %54 {strides = array<i32>} : memref<8x32xf32, #tpu.memory_space<vmem>>, vector<8x32xf32>,
    return
  }
  func.func @transform_0(%arg0: i32) -> (i32, i32, i32) {
    %c0_i32 = arith.constant 0 : i32
    %c0_i32_0 = arith.constant 0 : i32
    %c0_i32_1 = arith.constant 0 : i32
    return %c0_i32, %arg0, %c0_i32_0 : i32, i32, i32
  }
  func.func @transform_1(%arg0: i32) -> (i32, i32) {
    %c0_i32 = arith.constant 0 : i32
    %c0_i32_0 = arith.constant 0 : i32
    %c0_i32_1 = arith.constant 0 : i32
    return %c0_i32, %c0_i32_0 : i32, i32
  }
  func.func @transform_2(%arg0: i32) -> (i32, i32) {
    %c0_i32 = arith.constant 0 : i32
    %c0_i32_0 = arith.constant 0 : i32
    %c0_i32_1 = arith.constant 0 : i32
    return %c0_i32, %c0_i32_0 : i32, i32
  }
  func.func @transform_3(%arg0: i32) -> (i32, i32) {
    %c0_i32 = arith.constant 0 : i32
    %c0_i32_0 = arith.constant 0 : i32
    return %arg0, %c0_i32 : i32, i32
  }
}

</mosaic_0001>

<bundles_post_ra>
// kernel: tpu_custom_call.1
= control target key start
LH: loop header
LB: loop body
LE: loop exit
PB: predicated region body
PF: predicated region fallthrough
CT: control target
= control target key end

     0   :  { %v521_v1 = vmov 0   ;;  %vm90_vm0 = vcmask 261120   ;;  %s638_s0 = inlined_call_operand.vmem [shape: bf16[4,8,32], index: 0, kind: input, shape index: {}]   ;;  %s639_s1 = inlined_call_operand.vmem [shape: bf16[132,32], index: 1, kind: input, shape index: {}]   ;;  %s640_s2 = inlined_call_operand.vmem [shape: bf16[4,32], index: 2, kind: input, shape index: {}]   ;;  %s641_s3 = inlined_call_operand.hbm [shape: f32[8,32], index: 3, kind: output, shape index: {}]  }
   0x1   :  { %v478_v0 = vld [vmem:[%s639_s1 + $0x38] sm:$0xff]   ;;  %124 = vmatprep.subr.bf16.mxu0 %v521_v1  ;;  %156 = vmatprep.mubr.bf16.mxu0 %v521_v1  ;;  %v479_v3 = vld [vmem:[%s639_s1 + $0x30] sm:$0xff]  }
   0x2   :  { %v119_v2 = vsel %vm90_vm0, %v478_v0, 0  ;;  %v116_v4 = vsel %vm90_vm0, %v479_v3, 0 }
   0x3   :  { %125 = vmatpush1.bf16.xpose.msra.mxu0 %v119_v2 }
   0x4   :  { %126 = vmatprep.subr.bf16.mxu0 %v521_v1 }
   0xb   :  { %127 = vmatpush1.bf16.xpose.msra.mxu0 %v116_v4 }
   0xc   :  { %8 = vsyncpa [#allocation3], 0  ;;  %128 = vmatprep.subr.bf16.mxu0 %v521_v1  ;;  %v480_v5 = vld [vmem:[%s639_s1 + $0x28] sm:$0xff]   ;;  %v481_v7 = vld [vmem:[%s639_s1 + $0x20] sm:$0xff]   ;;  %vm226_vm1 = vcmask 1041408   ;;  %v522_v22 = vmov 0.0  }
   0xd   :  { %v113_v6 = vsel %vm90_vm0, %v480_v5, 0  ;;  %v110_v8 = vsel %vm90_vm0, %v481_v7, 0  ;;  %v482_v9 = vld [vmem:[%s639_s1 + $0x18] sm:$0xff]   ;;  %v483_v11 = vld [vmem:[%s639_s1 + $0x10] sm:$0xff]   ;;  %v484_v13 = vld [vmem:[%s639_s1 + $0x8] sm:$0xff]   ;;  %450 = vmatprep.subr.bf16.mxu1 %v522_v22  ;;  %vm523_vm2 = vmmov 0  }
   0xe   :  { %v107_v10 = vsel %vm90_vm0, %v482_v9, 0  ;;  %v104_v12 = vsel %vm90_vm0, %v483_v11, 0  ;;  %v101_v14 = vsel %vm90_vm0, %v484_v13, 0  ;;  %v485_v15 = vld [vmem:[%s639_s1] sm:$0xff]   ;;  %v488_v20 = vld [vmem:[%s638_s0 + $0x8] sm:$0xff]   ;;  %452 = vmatprep.mubr.msk.bf16.mxu1 %vm523_vm2, %v522_v22  ;;  %vm189_vm6 = vcmask 31744  }
   0xf   :  { %v98_v16 = vsel %vm90_vm0, %v485_v15, 0  ;;  %v486_v17 = vld [vmem:[%s639_s1 + $0x40] ss:$0 sps:$4 sm:$0x33]  }
  0x10   :  { %v122_v18 = vsel %vm90_vm0, %v486_v17, 0  ;;  %v487_v19 = vld [vmem:[%s638_s0] sm:$0xff]   ;;  %s524_s0 = smov [#allocation2]  }
  0x11   :  { %v221_v21 = vld [vmem:[%s640_s2] sm:$0x3]  ;;  %s417_s1 = sshll.u32 %s524_s0, 4  ;;  %s418_s1 = int_to_ptr.vmem [resolvable:$true] %s417_s1 }
  0x12   :  { %v593_v23 = vsel %vm226_vm1, %v221_v21, 0  ;;  %s499_s2 = scalar_lea.vmem %s418_s1, 128  ;;  %p504_p1 = scmp.lt.s32.totalorder %s418_s1, %s418_s1 }
  0x13   :  { %129 = vmatpush1.bf16.xpose.msra.mxu0 %v113_v6  ;;  %451 = vmatpush3.bf16.msra.mxu1 %v593_v23  ;;  %p500_p0 = scmp.ne.s32.totalorder %s418_s1, %s499_s2  ;;  %p505_p2 = scmp.lt.s32.totalorder %s499_s2, %s499_s2 }
  0x14   :  { %130 = vmatprep.subr.bf16.mxu0 %v521_v1  ;;  %456 = vmatprep.subr.bf16.mxu1 %v522_v22 }
  0x15   :  { %p506_p3 = por %p505_p2, %p504_p1 }
  0x17   :  { %p507_p4 = pnand %p506_p3, %p500_p0 }
  0x1b   :  { %131 = vmatpush1.bf16.xpose.msra.mxu0 %v110_v8 }
  0x1c   :  { %132 = vmatprep.subr.bf16.mxu0 %v521_v1 }
  0x23   :  { %133 = vmatpush1.bf16.xpose.msra.mxu0 %v107_v10 }
  0x24   :  { %134 = vmatprep.subr.bf16.mxu0 %v521_v1 }
  0x2b   :  { %135 = vmatpush1.bf16.xpose.msra.mxu0 %v104_v12 }
  0x2c   :  { %136 = vmatprep.subr.bf16.mxu0 %v521_v1 }
  0x33   :  { %137 = vmatpush1.bf16.xpose.msra.mxu0 %v101_v14 }
  0x34   :  { %138 = vmatprep.subr.bf16.mxu0 %v521_v1 }
  0x3b   :  { %139 = vmatpush1.bf16.xpose.msra.mxu0 %v98_v16 }
  0x3c   :  { %154 = vmatprep.subr.bf16.mxu0 %v521_v1 }
  0x43   :  { %155 = vmatpush2.bf16.xpose.msra.mxu0 %v122_v18 }
  0x4a   :  { %436 = vmatmul.mubr.msk.bf16.vlgmr.msra.gmra.mxu0 %vm90_vm0, %v487_v19 }
  0x4b   :  { %166 = vmatprep.mubr.bf16.mxu0 %v521_v1 }
  0x52   :  { %437 = vmatmul.mubr.msk.bf16.gmra.mxu0 %vm90_vm0, %v488_v20 }
 0x10a   :  { %v599_v24 = vpop.f32.mrf.mxu0 }
 0x10c   :  { %v160_v25 = vpop.f32.mrf.mxu0 }
 0x10d   :  { %v181_v31 = vmul.f32 0.2, %v160_v25  ;;  %vm177_vm4 = vcmp.gt.f32.partialorder %v160_v25, 0.0 }
 0x10e   :  { %v601_v26 = vpop.f32.mrf.mxu0 }
 0x10f   :  { %v185_v36 = vsel %vm177_vm4, %v160_v25, %v181_v31 }
 0x110   :  { %v164_v27 = vpop.f32.mrf.mxu0  ;;  %v190_v41 = vsel %vm189_vm6, %v185_v36, -inf }
 0x111   :  { %v182_v29 = vmul.f32 0.2, %v164_v27  ;;  %vm178_vm3 = vcmp.gt.f32.partialorder %v164_v27, 0.0 }
 0x112   :  { %v603_v28 = vpop.f32.mrf.mxu0 }
 0x113   :  { %v186_v34 = vsel %vm178_vm3, %v164_v27, %v182_v29 }
 0x114   :  { %v170_v30 = vpop.f32.mrf.mxu0  ;;  %v191_v39 = vsel %vm189_vm6, %v186_v34, -inf }
 0x115   :  { %v183_v32 = vmul.f32 0.2, %v170_v30  ;;  %vm179_vm5 = vcmp.gt.f32.partialorder %v170_v30, 0.0  ;;  %v194_v44 = vmax.f32 %v190_v41, %v191_v39 }
 0x116   :  { %v605_v33 = vpop.f32.mrf.mxu0 }
 0x117   :  { %v187_v37 = vsel %vm179_vm5, %v170_v30, %v183_v32 }
 0x118   :  { %v174_v35 = vpop.f32.mrf.mxu0  ;;  %v192_v42 = vsel %vm189_vm6, %v187_v37, -inf }
 0x119   :  { %vm180_vm7 = vcmp.gt.f32.partialorder %v174_v35, 0.0  ;;  %v184_v38 = vmul.f32 0.2, %v174_v35 }
 0x11b   :  { %v188_v40 = vsel %vm180_vm7, %v174_v35, %v184_v38 }
 0x11c   :  { %v193_v43 = vsel %vm189_vm6, %v188_v40, -inf }
 0x11d   :  { %v195_v45 = vmax.f32 %v192_v42, %v193_v43 }
 0x11f   :  { %v196_v46 = vmax.f32 %v194_v44, %v195_v45 }
 0x121   :  { %v197_v47 = vsub.f32 %v185_v36, %v196_v46  ;;  %v198_v48 = vsub.f32 %v186_v34, %v196_v46  ;;  %v199_v49 = vsub.f32 %v187_v37, %v196_v46  ;;  %v200_v50 = vsub.f32 %v188_v40, %v196_v46 }
 0x123   :  { %v201_v51 = vmul.f32 1.442695, %v197_v47  ;;  %v203_v52 = vmul.f32 1.442695, %v198_v48  ;;  %v205_v53 = vmul.f32 1.442695, %v199_v49 }
 0x124   :  { %v207_v54 = vmul.f32 1.442695, %v200_v50 }
 0x125   :  { %489 = vpow2.f32 %v201_v51 }
 0x126   :  { %491 = vpow2.f32 %v203_v52 }
 0x127   :  { %493 = vpow2.f32 %v205_v53 }
 0x128   :  { %495 = vpow2.f32 %v207_v54 }
 0x132   :  { %v490_v55 = vpop.eup %489 }
 0x133   :  { %v492_v56 = vpop.eup %491  ;;  %v209_v57 = vsel %vm189_vm6, %v490_v55, 0.0 }
 0x134   :  { %v494_v58 = vpop.eup %493  ;;  %v210_v59 = vsel %vm189_vm6, %v492_v56, 0.0 }
 0x135   :  { %v496_v60 = vpop.eup %495  ;;  %v211_v61 = vadd.f32 %v210_v59, %v209_v57  ;;  %v212_v62 = vsel %vm189_vm6, %v494_v58, 0.0 }
 0x136   :  { %v214_v0 = vsel %vm189_vm6, %v496_v60, 0.0 }
 0x137   :  { %v213_v63 = vadd.f32 %v212_v62, %v211_v61 }
 0x139   :  { %v215_v1 = vadd.f32 %v214_v0, %v213_v63 }
 0x13b   :  { %497 = vrcp.f32 %v215_v1 }
 0x148   :  { %v498_v2 = vpop.eup %497 }
 0x149   :  { %v217_v3 = vmul.f32 %v498_v2, %v490_v55  ;;  %v218_v5 = vmul.f32 %v498_v2, %v492_v56  ;;  %v219_v7 = vmul.f32 %v498_v2, %v494_v58  ;;  %v220_v9 = vmul.f32 %v498_v2, %v496_v60 }
 0x14b   :  { %v222_v4 = vpack.c.bf16 %v217_v3, %v217_v3  ;;  %v272_v6 = vpack.c.bf16 %v218_v5, %v218_v5  ;;  %v318_v8 = vpack.c.bf16 %v219_v7, %v219_v7  ;;  %v364_v10 = vpack.c.bf16 %v220_v9, %v220_v9 }
 0x14d   :  { %453 = vmatmul.mubr.msk.bf16.vlgmr.msra.gmra.mxu1 %vm189_vm6, %v222_v4 }
 0x14e   :  { %457 = vmatpush3.bf16.msra.mxu1 %v593_v23  ;;  %458 = vmatprep.mubr.msk.bf16.mxu1 %vm523_vm2, %v522_v22 }
 0x14f   :  { %462 = vmatprep.subr.bf16.mxu1 %v522_v22 }
 0x155   :  { %459 = vmatmul.mubr.msk.bf16.vlgmr.msra.gmra.mxu1 %vm189_vm6, %v272_v6 }
 0x156   :  { %463 = vmatpush3.bf16.msra.mxu1 %v593_v23  ;;  %464 = vmatprep.mubr.msk.bf16.mxu1 %vm523_vm2, %v522_v22 }
 0x157   :  { %468 = vmatprep.subr.bf16.mxu1 %v522_v22 }
 0x15d   :  { %465 = vmatmul.mubr.msk.bf16.vlgmr.msra.gmra.mxu1 %vm189_vm6, %v318_v8 }
 0x15e   :  { %469 = vmatpush3.bf16.msra.mxu1 %v593_v23  ;;  %470 = vmatprep.mubr.msk.bf16.mxu1 %vm523_vm2, %v522_v22 }
 0x165   :  { %471 = vmatmul.mubr.msk.bf16.vlgmr.msra.gmra.mxu1 %vm189_vm6, %v364_v10 }
 0x20d   :  { %v264_v11 = vpop.f32.mrf.mxu1 }
 0x20e   :  { %v270_v25 = vmul.f32 %v264_v11, %v599_v24 }
 0x20f   :  { %v454_v12 = vpop.f32.mrf.mxu1 }
 0x211   :  { %v267_v13 = vpop.f32.mrf.mxu1 }
 0x213   :  { %v455_v14 = vpop.f32.mrf.mxu1 }
 0x215   :  { %v310_v15 = vpop.f32.mrf.mxu1 }
 0x216   :  { %v316_v21 = vmul.f32 %v310_v15, %v601_v26 }
 0x217   :  { %v460_v16 = vpop.f32.mrf.mxu1 }
 0x218   :  { %v317_v29 = vadd.f32 %v316_v21, %v270_v25 }
 0x219   :  { %v313_v17 = vpop.f32.mrf.mxu1 }
 0x21b   :  { %v461_v18 = vpop.f32.mrf.mxu1 }
 0x21d   :  { %v356_v19 = vpop.f32.mrf.mxu1 }
 0x21e   :  { %v362_v22 = vmul.f32 %v356_v19, %v603_v28 }
 0x21f   :  { %v466_v20 = vpop.f32.mrf.mxu1 }
 0x220   :  { %v363_v31 = vadd.f32 %v362_v22, %v317_v29 }
 0x221   :  { %v359_v23 = vpop.f32.mrf.mxu1 }
 0x223   :  { %v467_v27 = vpop.f32.mrf.mxu1 }
 0x225   :  { %v402_v30 = vpop.f32.mrf.mxu1 }
 0x226   :  { %v408_v32 = vmul.f32 %v402_v30, %v605_v33 }
 0x227   :  { %v472_v34 = vpop.f32.mrf.mxu1 }
 0x228   :  { %v409_v35 = vadd.f32 %v408_v32, %v363_v31 }
 0x229   :  { %v405_v36 = vpop.f32.mrf.mxu1 }
 0x22a   :  { %410 = vst.msk [vmem:[#allocation2] sm:$0xff] %vm90_vm0, %v409_v35 }
 0x22b   :  { %v473_v26 = vpop.f32.mrf.mxu1 }
 0x22c   :  { %510 = shalt.err (!%p507_p4)
}
 0x22d   :  { %420 = dma.vmem_to_hbm [thread:$0]  %s418_s1, 128, %s641_s3, [#allocation3]  }
 0x22e   :  { %519 = dma.done.wait [#allocation3], 128  }
 0x22f   :  { %520 = vsyncadd [#allocation3], 4294967168 }
 0x230   :  { %424 = vsyncpa [#allocation3], 1 }

</bundles_post_ra>
